<compile_context>
chip_gen: v6e
topology: v6e:2x2x1
jax: 0.10.0
libtpu: 0.0.40
codegen_flags: <defaults>
</compile_context>

<pallas_src>
import math

import jax
import jax.numpy as jnp
from jax.experimental import pallas as pl
from jax.experimental.pallas import tpu as pltpu

KERNEL_SIZE = 8                 # HEncLayer default
STRIDE = 4                      # HEncLayer default
MAX_LANE_TILE = 32768           # hard cap on the lane tile (multiple of 128)
COMPUTE_DTYPE = jnp.bfloat16    # matmul operand dtype (f32 MXU accumulation)


# --------------------------- generation-aware tiling ---------------------------
def _physical_vmem_bytes():
    """Per-TensorCore VMEM capacity by device generation (conservative default)."""
    try:
        kind = jax.devices()[0].device_kind.lower()
    except Exception:
        kind = ""
    if "v7" in kind or "7x" in kind:
        return 64 * 1024 * 1024
    if any(tag in kind for tag in ("v4", "v5", "v6")):
        return 128 * 1024 * 1024
    return 64 * 1024 * 1024     # unknown generation: assume the smallest


def _vmem_limit_bytes():
    # Leave headroom for Mosaic internal scratch (do NOT request all 64 MiB on v7x).
    return min((_physical_vmem_bytes() * 3) // 4, 100 * 1024 * 1024)


def _pick_lane_tile(N, KC, O_pad, out_bytes, B, vmem_limit):
    """Largest lane tile (multiple of 128, or the full extent N) such that the
    double-buffered x/out blocks plus f32 intermediates fit the VMEM budget,
    and the grid keeps >= ~4 points so both v7x TensorCores get work at B==1."""
    per_lane = 4 * KC + O_pad * (2 * out_bytes + 28)          # bytes per lane
    weight_bytes = 4 * (O_pad * KC + 2 * O_pad * O_pad + 3 * O_pad)
    budget = (vmem_limit * 7) // 10 - weight_bytes
    tn = max(budget // per_lane, 128)
    want_tiles = -(-4 // max(B, 1))                           # ceil(4 / B)
    if N >= want_tiles * 128:
        tn = min(tn, N // want_tiles)
    tn = min(tn, MAX_LANE_TILE)
    if tn >= N:
        return N
    return max(128, (tn // 128) * 128)


# ------------------------------- elementwise math -------------------------------
def _erf_f32(x):
    # float32 erf via the rational polynomial XLA uses on TPU (ErfImpl32).
    # Only mul/add/div/clamp -> always lowers in Mosaic.
    alpha = (0.00022905065861350646, 0.0034082910107109506,
             0.050955695062380861, 0.18520832239976145, 1.128379143519084)
    beta = (-1.1791602954361697e-7, 0.000023547966471313185,
            0.0010179625278914885, 0.014070470171167667,
            0.11098505178285362, 0.49746925110067538, 1.0)
    x = jnp.clip(x, -3.832506856900711, 3.832506856900711)
    x2 = x * x
    p = alpha[0]
    for c in alpha[1:]:
        p = p * x2 + c
    q = beta[0]
    for c in beta[1:]:
        q = q * x2 + c
    return (x * p) / q


def _gelu_exact(x):
    # Matches torch.nn.functional.gelu default (erf-based GELU).
    return 0.5 * x * (1.0 + _erf_f32(x * (1.0 / math.sqrt(2.0))))


# ----------------------------------- kernel -----------------------------------
def _make_band_kernel(o_split):
    def kernel(x_ref, w1_ref, b1_ref, w2_ref, b2_ref, out_ref):
        # x_ref  : (1, K*C, TN)   im2col'd band input; lanes = fused (Fout, T)
        # w1_ref : (O, K*C)       conv weight (im2col layout), bf16
        # b1_ref : (O, 1)         conv bias, f32
        # w2_ref : (2O, O)        fused 1x1 rewrite weight (value rows, then gate rows)
        # b2_ref : (2O, 1)        fused rewrite bias, f32
        # out_ref: (1, O, TN)
        x = x_ref[0]                                                   # (K*C, TN)
        acc = jnp.dot(w1_ref[...], x, preferred_element_type=jnp.float32)
        acc = acc + b1_ref[...]                                        # one broadcast
        g = _gelu_exact(acc)                                           # norm1 == Identity
        gc = g.astype(w2_ref.dtype)
        z = jnp.dot(w2_ref[...], gc, preferred_element_type=jnp.float32)
        z = z + b2_ref[...]
        # GLU over channels: rows [:O] = value half, rows [O:] = gate half.
        out_ref[0] = (z[:o_split] * jax.nn.sigmoid(z[o_split:])).astype(out_ref.dtype)
    return kernel


def _henc_band(y, conv_w, conv_b, rew_w, rew_b, *, K, S,
               compute_dtype=COMPUTE_DTYPE, out_dtype=jnp.float32):
    """One HEncLayer clone (conv padding = 0) applied to one pre-padded band."""
    B, C, Fin, T = y.shape
    O = conv_w.shape[0]
    assert K % S == 0, "im2col residue layout assumes kernel_size % stride == 0"
    J = K // S
    Fout = (Fin - K) // S + 1
    P = Fout + J - 1
    N = Fout * T
    KC = K * C
    O_pad = -(-O // 8) * 8          # keep the lane-dense store unmasked (v5e)

    # ---- host-side layout glue (bf16; fused into the kernel input DMA when
    # XLA accepts the allow_input_fusion hint, else a single HBM round-trip) ----
    y = y.astype(compute_dtype)
    y = y[:, :, :S * P, :]                       # rows the conv would ignore
    # (B, C, P, S, T) -> (B, S, C, P, T) -> (B, S*C, P, T):
    # row index r*C + c holds y[:, c, p*S + r, :]
    xr = y.reshape(B, C, P, S, T).transpose(0, 3, 1, 2, 4).reshape(B, S * C, P, T)
    # Stack the J tap-groups along the contraction axis -> (B, K*C, Fout*T),
    # lanes = fused (frame, time): lane-dense input for the MXU.
    xim = jnp.concatenate(
        [xr[:, :, j:j + Fout, :].reshape(B, S * C, N) for j in range(J)], axis=1)

    # Conv weight flattened to (O, K*C) with index k*C + c matching xim rows;
    # the two GLU rewrite halves are fused into one (2O, O) weight / (2O,1) bias.
    w1 = conv_w[:, :, :, 0].transpose(0, 2, 1).reshape(O, KC)
    b1 = conv_b
    w2 = rew_w[:, :, 0, 0]                        # (2O, O)
    w2v, w2g = w2[:O], w2[O:]
    b2v, b2g = rew_b[:O], rew_b[O:]
    if O_pad != O:
        po = O_pad - O
        w1 = jnp.pad(w1, ((0, po), (0, 0)))
        b1 = jnp.pad(b1, ((0, po),))
        w2v = jnp.pad(w2v, ((0, po), (0, po)))
        w2g = jnp.pad(w2g, ((0, po), (0, po)))
        b2v = jnp.pad(b2v, ((0, po),))
        b2g = jnp.pad(b2g, ((0, po),))
    w1 = w1.astype(compute_dtype)
    b1 = b1.reshape(O_pad, 1).astype(jnp.float32)
    w2f = jnp.concatenate([w2v, w2g], axis=0).astype(compute_dtype)
    b2f = jnp.concatenate([b2v, b2g], axis=0).reshape(2 * O_pad, 1).astype(jnp.float32)

    out_bytes = jnp.dtype(out_dtype).itemsize
    vmem_limit = _vmem_limit_bytes()
    TN = _pick_lane_tile(N, KC, O_pad, out_bytes, B, vmem_limit)
    grid = (B, pl.cdiv(N, TN))

    flops = 2 * B * N * (O_pad * KC + 2 * O_pad * O_pad)
    bytes_accessed = (B * KC * N * 2 + B * O_pad * N * out_bytes
                      + 2 * (O_pad * KC + 2 * O_pad * O_pad) + 12 * O_pad)
    cost = pl.CostEstimate(flops=int(flops),
                           transcendentals=int(B * O_pad * N),
                           bytes_accessed=int(bytes_accessed))

    out = pl.pallas_call(
        _make_band_kernel(O_pad),
        out_shape=jax.ShapeDtypeStruct((B, O_pad, N), out_dtype),
        grid=grid,
        in_specs=[
            pl.BlockSpec((1, KC, TN), lambda b, n: (b, 0, n)),
            pl.BlockSpec((O_pad, KC), lambda b, n: (0, 0)),
            pl.BlockSpec((O_pad, 1), lambda b, n: (0, 0)),
            pl.BlockSpec((2 * O_pad, O_pad), lambda b, n: (0, 0)),
            pl.BlockSpec((2 * O_pad, 1), lambda b, n: (0, 0)),
        ],
        out_specs=pl.BlockSpec((1, O_pad, TN), lambda b, n: (b, 0, n)),
        compiler_params=pltpu.CompilerParams(
            dimension_semantics=("parallel", "parallel"),
            vmem_limit_bytes=vmem_limit,
            allow_input_fusion=[True, False, False, False, False],
        ),
        cost_estimate=cost,
    )(xim, w1, b1, w2f, b2f)
    if O_pad != O:
        out = out[:, :O]
    return out.reshape(B, O, Fout, T)             # contiguous -> cheap reshape


# ------------------------------ band bookkeeping ------------------------------
def _split_bands(x, split_ratios, K, S):
    """MultiWrap's band slicing/padding bookkeeping (static Python glue)."""
    B, C, Fr, T = x.shape
    pad = K // 4
    ratios = list(split_ratios) + [1]
    start = 0
    bands = []
    for ratio in ratios:
        if ratio == 1:
            limit = Fr
        else:
            limit = int(round(Fr * ratio))
            le = limit - start
            if start == 0:
                le += pad
            frames = round((le - K) / S + 1)
            limit = start + (frames - 1) * S + K
            if start == 0:
                limit -= pad
        assert limit - start > 0, (limit, start)
        assert limit <= Fr, (limit, Fr)
        y = x[:, :, start:limit, :]
        if start == 0:
            y = jnp.pad(y, ((0, 0), (0, 0), (pad, 0), (0, 0)))
        if ratio == 1:
            y = jnp.pad(y, ((0, 0), (0, 0), (0, pad), (0, 0)))
        bands.append(y)
        start = limit - K + S
    return bands


def multiwrap_forward(x, band_params, split_ratios, K=KERNEL_SIZE, S=STRIDE,
                      compute_dtype=COMPUTE_DTYPE, out_dtype=jnp.float32):
    """MultiWrap.forward for the conv (HEncLayer) case. x: (B, C, Fr, T)."""
    bands = _split_bands(x, split_ratios, K, S)
    outs = [_henc_band(y, *params, K=K, S=S, compute_dtype=compute_dtype,
                       out_dtype=out_dtype)
            for y, params in zip(bands, band_params)]
    return jnp.concatenate(outs, axis=2)


# ----------------------------- pure-JAX reference -----------------------------
def _reference_band(y, conv_w, conv_b, rew_w, rew_b, *, K, S, compute_dtype):
    rd = lambda a: a.astype(compute_dtype).astype(jnp.float32)
    B, C, Fin, T = y.shape
    O = conv_w.shape[0]
    Fout = (Fin - K) // S + 1
    yq = rd(y)
    wq = rd(conv_w[:, :, :, 0])                   # (O, C, K)
    acc = jnp.zeros((B, O, Fout, T), jnp.float32) + conv_b.reshape(1, O, 1, 1)
    for k in range(K):
        xk = yq[:, :, k:k + (Fout - 1) * S + 1:S, :]          # (B, C, Fout, T)
        acc = acc + jnp.einsum('oc,bcft->boft', wq[:, :, k], xk,
                               precision=jax.lax.Precision.HIGHEST)
    g = 0.5 * acc * (1.0 + jax.lax.erf(acc / math.sqrt(2.0)))
    gq = rd(g)
    w2 = rd(rew_w[:, :, 0, 0])
    z = jnp.einsum('po,boft->bpft', w2, gq,
                   precision=jax.lax.Precision.HIGHEST) + rew_b.reshape(1, 2 * O, 1, 1)
    return z[:, :O] * jax.nn.sigmoid(z[:, O:])


def multiwrap_reference(x, band_params, split_ratios, K=KERNEL_SIZE, S=STRIDE,
                        compute_dtype=COMPUTE_DTYPE):
    bands = _split_bands(x, split_ratios, K, S)
    outs = [_reference_band(y, *params, K=K, S=S, compute_dtype=compute_dtype)
            for y, params in zip(bands, band_params)]
    return jnp.concatenate(outs, axis=2)


def init_multiwrap_params(key, chin, chout, n_bands, K=KERNEL_SIZE):
    """Deterministic per-band parameters (MultiWrap resets each clone's params)."""
    params = []
    for _ in range(n_bands):
        key, k1, k2, k3, k4 = jax.random.split(key, 5)
        lim1 = 1.0 / math.sqrt(chin * K)          # Conv2d-style uniform init
        conv_w = jax.random.uniform(k1, (chout, chin, K, 1), jnp.float32, -lim1, lim1)
        conv_b = jax.random.uniform(k2, (chout,), jnp.float32, -lim1, lim1)
        lim2 = 1.0 / math.sqrt(chout)
        rew_w = jax.random.uniform(k3, (2 * chout, chout, 1, 1), jnp.float32, -lim2, lim2)
        rew_b = jax.random.uniform(k4, (2 * chout,), jnp.float32, -lim2, lim2)
        params.append((conv_w, conv_b, rew_w, rew_b))
    return params


if __name__ == "__main__":
    # Small shapes: B=2, chin=4, Fr=16 freq bins, T=16 time frames, chout=8.
    B, C, Fr, T = 2, 4, 16, 16
    chout = 8
    split_ratios = [0.5]                          # -> 2 frequency bands

    key = jax.random.PRNGKey(0)
    kx, kp = jax.random.split(key)
    x = jax.random.normal(kx, (B, C, Fr, T), jnp.float32)
    params = init_multiwrap_params(kp, C, chout, len(split_ratios) + 1)

    # jit the whole forward so the im2col layout glue can fuse into the kernel
    # input DMA (allow_input_fusion) instead of materializing in HBM.
    fwd = jax.jit(lambda xx, pp: multiwrap_forward(xx, pp, split_ratios))
    out = jax.block_until_ready(fwd(x, params))
    assert out.shape == (B, chout, Fr // STRIDE, T), out.shape
    assert bool(jnp.all(jnp.isfinite(out)))

    # Correctness check against a pure-JAX reference with the same bf16 operand
    # rounding (f32 accumulation); differences are accumulation-order level.
    ref = multiwrap_reference(x, params, split_ratios)
    err = float(jnp.max(jnp.abs(out - ref)))
    assert err < 1e-2, ("max abs err vs reference", err)

    print("KERNEL_OK")
</pallas_src>

<mosaic_0001>
module attributes {stable_mosaic.version = 11 : i64} {
  func.func @kernel(%arg0: i32, %arg1: i32, %arg2: memref<1x32x32xbf16, #tpu.memory_space<vmem>>, %arg3: memref<8x32xbf16, #tpu.memory_space<vmem>>, %arg4: memref<8x1xf32, #tpu.memory_space<vmem>>, %arg5: memref<16x8xbf16, #tpu.memory_space<vmem>>, %arg6: memref<16x1xf32, #tpu.memory_space<vmem>>, %arg7: memref<1x8x32xf32, #tpu.memory_space<vmem>>) attributes {dimension_semantics = [#tpu.dimension_semantics<parallel>, #tpu.dimension_semantics<parallel>], iteration_bounds = array<i64: 2, 1>, scalar_prefetch = 0 : i64, scratch_operands = 0 : i64, tpu.core_type = #tpu.core_type<tc>, window_params = [{transform_indices = @transform_0, window_bounds = array<i64: 1, 32, 32>}, {pipeline_mode = #tpu.pipeline_mode<synchronous>, transform_indices = @transform_1, window_bounds = array<i64: 8, 32>}, {pipeline_mode = #tpu.pipeline_mode<synchronous>, transform_indices = @transform_2, window_bounds = array<i64: 8, 1>}, {pipeline_mode = #tpu.pipeline_mode<synchronous>, transform_indices = @transform_3, window_bounds = array<i64: 16, 8>}, {pipeline_mode = #tpu.pipeline_mode<synchronous>, transform_indices = @transform_4, window_bounds = array<i64: 16, 1>}, {transform_indices = @transform_5, window_bounds = array<i64: 1, 8, 32>}]} {
    %c0 = arith.constant 0 : index
    %c0_0 = arith.constant 0 : index
    %c0_1 = arith.constant 0 : index
    %0 = vector.load %arg2[%c0, %c0_0, %c0_1] : memref<1x32x32xbf16, #tpu.memory_space<vmem>>, vector<1x32x32xbf16>
    %1 = vector.shape_cast %0 : vector<1x32x32xbf16> to vector<32x32xbf16>
    %c0_2 = arith.constant 0 : index
    %c0_3 = arith.constant 0 : index
    %2 = vector.load %arg3[%c0_2, %c0_3] : memref<8x32xbf16, #tpu.memory_space<vmem>>, vector<8x32xbf16>
    %cst = arith.constant dense<0.000000e+00> : vector<8x32xf32>
    %3 = tpu.matmul %2, %1, %cst {dimension_numbers = #tpu.dot_dimension_numbers<[1], [0], [0], [1], [0, 0, 1, 1], [], []>} : vector<8x32xbf16>, vector<32x32xbf16>, vector<8x32xf32> -> vector<8x32xf32>
    %c0_4 = arith.constant 0 : index
    %c0_5 = arith.constant 0 : index
    %4 = vector.load %arg4[%c0_4, %c0_5] : memref<8x1xf32, #tpu.memory_space<vmem>>, vector<8x1xf32>
    %5 = vector.broadcast %4 : vector<8x1xf32> to vector<8x32xf32>
    %6 = arith.addf %3, %5 : vector<8x32xf32>
    %cst_6 = arith.constant 5.000000e-01 : f32
    %7 = vector.broadcast %cst_6 : f32 to vector<8x32xf32>
    %8 = arith.mulf %7, %6 : vector<8x32xf32>
    %cst_7 = arith.constant 0.707106769 : f32
    %9 = vector.broadcast %cst_7 : f32 to vector<8x32xf32>
    %10 = arith.mulf %6, %9 : vector<8x32xf32>
    %cst_8 = arith.constant -3.8325069 : f32
    %cst_9 = arith.constant 3.8325069 : f32
    %11 = vector.broadcast %cst_8 : f32 to vector<8x32xf32>
    %12 = arith.maximumf %11, %10 : vector<8x32xf32>
    %13 = vector.broadcast %cst_9 : f32 to vector<8x32xf32>
    %14 = arith.minimumf %13, %12 : vector<8x32xf32>
    %15 = arith.mulf %14, %14 : vector<8x32xf32>
    %cst_10 = arith.constant 2.29050653E-4 : f32
    %16 = vector.broadcast %cst_10 : f32 to vector<8x32xf32>
    %17 = arith.mulf %16, %15 : vector<8x32xf32>
    %cst_11 = arith.constant 0.00340829091 : f32
    %18 = vector.broadcast %cst_11 : f32 to vector<8x32xf32>
    %19 = arith.addf %17, %18 : vector<8x32xf32>
    %20 = arith.mulf %19, %15 : vector<8x32xf32>
    %cst_12 = arith.constant 0.0509556942 : f32
    %21 = vector.broadcast %cst_12 : f32 to vector<8x32xf32>
    %22 = arith.addf %20, %21 : vector<8x32xf32>
    %23 = arith.mulf %22, %15 : vector<8x32xf32>
    %cst_13 = arith.constant 0.185208321 : f32
    %24 = vector.broadcast %cst_13 : f32 to vector<8x32xf32>
    %25 = arith.addf %23, %24 : vector<8x32xf32>
    %26 = arith.mulf %25, %15 : vector<8x32xf32>
    %cst_14 = arith.constant 1.12837911 : f32
    %27 = vector.broadcast %cst_14 : f32 to vector<8x32xf32>
    %28 = arith.addf %26, %27 : vector<8x32xf32>
    %cst_15 = arith.constant -1.17916031E-7 : f32
    %29 = vector.broadcast %cst_15 : f32 to vector<8x32xf32>
    %30 = arith.mulf %29, %15 : vector<8x32xf32>
    %cst_16 = arith.constant 2.35479656E-5 : f32
    %31 = vector.broadcast %cst_16 : f32 to vector<8x32xf32>
    %32 = arith.addf %30, %31 : vector<8x32xf32>
    %33 = arith.mulf %32, %15 : vector<8x32xf32>
    %cst_17 = arith.constant 0.00101796258 : f32
    %34 = vector.broadcast %cst_17 : f32 to vector<8x32xf32>
    %35 = arith.addf %33, %34 : vector<8x32xf32>
    %36 = arith.mulf %35, %15 : vector<8x32xf32>
    %cst_18 = arith.constant 0.0140704699 : f32
    %37 = vector.broadcast %cst_18 : f32 to vector<8x32xf32>
    %38 = arith.addf %36, %37 : vector<8x32xf32>
    %39 = arith.mulf %38, %15 : vector<8x32xf32>
    %cst_19 = arith.constant 0.110985048 : f32
    %40 = vector.broadcast %cst_19 : f32 to vector<8x32xf32>
    %41 = arith.addf %39, %40 : vector<8x32xf32>
    %42 = arith.mulf %41, %15 : vector<8x32xf32>
    %cst_20 = arith.constant 0.497469246 : f32
    %43 = vector.broadcast %cst_20 : f32 to vector<8x32xf32>
    %44 = arith.addf %42, %43 : vector<8x32xf32>
    %45 = arith.mulf %44, %15 : vector<8x32xf32>
    %cst_21 = arith.constant 1.000000e+00 : f32
    %46 = vector.broadcast %cst_21 : f32 to vector<8x32xf32>
    %47 = arith.addf %45, %46 : vector<8x32xf32>
    %48 = arith.mulf %14, %28 : vector<8x32xf32>
    %49 = arith.divf %48, %47 : vector<8x32xf32>
    %cst_22 = arith.constant 1.000000e+00 : f32
    %50 = vector.broadcast %cst_22 : f32 to vector<8x32xf32>
    %51 = arith.addf %50, %49 : vector<8x32xf32>
    %52 = arith.mulf %8, %51 : vector<8x32xf32>
    %53 = arith.truncf %52 : vector<8x32xf32> to vector<8x32xbf16>
    %c0_23 = arith.constant 0 : index
    %c0_24 = arith.constant 0 : index
    %54 = vector.load %arg5[%c0_23, %c0_24] : memref<16x8xbf16, #tpu.memory_space<vmem>>, vector<16x8xbf16>
    %cst_25 = arith.constant dense<0.000000e+00> : vector<16x32xf32>
    %55 = tpu.matmul %54, %53, %cst_25 {dimension_numbers = #tpu.dot_dimension_numbers<[1], [0], [0], [1], [0, 0, 1, 1], [], []>} : vector<16x8xbf16>, vector<8x32xbf16>, vector<16x32xf32> -> vector<16x32xf32>
    %c0_26 = arith.constant 0 : index
    %c0_27 = arith.constant 0 : index
    %56 = vector.load %arg6[%c0_26, %c0_27] : memref<16x1xf32, #tpu.memory_space<vmem>>, vector<16x1xf32>
    %57 = vector.broadcast %56 : vector<16x1xf32> to vector<16x32xf32>
    %58 = arith.addf %55, %57 : vector<16x32xf32>
    %59 = vector.extract_strided_slice %58 {offsets = [0, 0], sizes = [8, 32], strides = [1, 1]} : vector<16x32xf32> to vector<8x32xf32>
    %60 = vector.extract_strided_slice %58 {offsets = [8, 0], sizes = [8, 32], strides = [1, 1]} : vector<16x32xf32> to vector<8x32xf32>
    %61 = arith.negf %60 : vector<8x32xf32>
    %62 = math.exp %61 : vector<8x32xf32>
    %cst_28 = arith.constant 1.000000e+00 : f32
    %63 = vector.broadcast %cst_28 : f32 to vector<8x32xf32>
    %64 = arith.addf %63, %62 : vector<8x32xf32>
    %65 = arith.divf %63, %64 : vector<8x32xf32>
    %66 = arith.mulf %59, %65 : vector<8x32xf32>
    %c0_29 = arith.constant 0 : index
    %c0_30 = arith.constant 0 : index
    %c0_31 = arith.constant 0 : index
    %67 = vector.load %arg7[%c0_29, %c0_30, %c0_31] : memref<1x8x32xf32, #tpu.memory_space<vmem>>, vector<1x8x32xf32>
    %68 = vector.shape_cast %67 : vector<1x8x32xf32> to vector<8x32xf32>
    %69 = vector.shape_cast %66 : vector<8x32xf32> to vector<1x8x32xf32>
    tpu.vector_store %arg7[%c0_29, %c0_30, %c0_31], %69 {strides = array<i32>} : memref<1x8x32xf32, #tpu.memory_space<vmem>>, vector<1x8x32xf32>,
    return
  }
  func.func @transform_0(%arg0: i32, %arg1: i32) -> (i32, i32, i32) {
    %c0_i32 = arith.constant 0 : i32
    %c0_i32_0 = arith.constant 0 : i32
    return %arg0, %c0_i32, %arg1 : i32, i32, i32
  }
  func.func @transform_1(%arg0: i32, %arg1: i32) -> (i32, i32) {
    %c0_i32 = arith.constant 0 : i32
    %c0_i32_0 = arith.constant 0 : i32
    %c0_i32_1 = arith.constant 0 : i32
    return %c0_i32, %c0_i32_0 : i32, i32
  }
  func.func @transform_2(%arg0: i32, %arg1: i32) -> (i32, i32) {
    %c0_i32 = arith.constant 0 : i32
    %c0_i32_0 = arith.constant 0 : i32
    %c0_i32_1 = arith.constant 0 : i32
    return %c0_i32, %c0_i32_0 : i32, i32
  }
  func.func @transform_3(%arg0: i32, %arg1: i32) -> (i32, i32) {
    %c0_i32 = arith.constant 0 : i32
    %c0_i32_0 = arith.constant 0 : i32
    %c0_i32_1 = arith.constant 0 : i32
    return %c0_i32, %c0_i32_0 : i32, i32
  }
  func.func @transform_4(%arg0: i32, %arg1: i32) -> (i32, i32) {
    %c0_i32 = arith.constant 0 : i32
    %c0_i32_0 = arith.constant 0 : i32
    %c0_i32_1 = arith.constant 0 : i32
    return %c0_i32, %c0_i32_0 : i32, i32
  }
  func.func @transform_5(%arg0: i32, %arg1: i32) -> (i32, i32, i32) {
    %c0_i32 = arith.constant 0 : i32
    %c0_i32_0 = arith.constant 0 : i32
    return %arg0, %c0_i32, %arg1 : i32, i32, i32
  }
}

</mosaic_0001>

<bundles_post_ra>
// kernel: _lambda_.4
= control target key start
LH: loop header
LB: loop body
LE: loop exit
PB: predicated region body
PF: predicated region fallthrough
CT: control target
= control target key end

     0   :  { %s874_s26 = smov 0   ;;  %s876_s27 = smov 0   ;;  %s940_s0 = inlined_call_operand.vmem [shape: bf16[8,32], index: 0, kind: input, shape index: {}]   ;;  %s941_s1 = inlined_call_operand.vmem [shape: f32[8,1], index: 1, kind: input, shape index: {}]   ;;  %s942_s2 = inlined_call_operand.vmem [shape: bf16[16,8], index: 2, kind: input, shape index: {}]   ;;  %s943_s3 = inlined_call_operand.vmem [shape: f32[16,1], index: 3, kind: input, shape index: {}]   ;;  %s944_s4 = inlined_call_operand.vmem [shape: bf16[2,16,32], index: 4, kind: input, shape index: {}]   ;;  %s945_s5 = inlined_call_operand.<no memory space> [shape: bf16[], index: 5, kind: input, shape index: {}]   ;;  %s946_s6 = inlined_call_operand.vmem [shape: bf16[2,16,32], index: 6, kind: input, shape index: {}]   ;;  %s947_s7 = inlined_call_operand.vmem [shape: f32[2,8,32], index: 7, kind: output, shape index: {}]  }
   0x1   :  { %v12_v0 = vstv %s945_s5  ;;  %s878_s28 = smov 0  }
   0x2   :  { %v872_v1 = vunpack.i.l.bf16 %v12_v0 }
   0x3 LB: > { %s39_s5 = sadd.s32 1, %s820_s27  ;;  %p724_p0 = scmp.ge.s32.totalorder %s824_s28, 1  ;;  %s824_s28 = sphi %s878_s28, %s27_s28   ;;  %s820_s27 = sphi %s876_s27, %s949_s27   ;;  %s816_s26 = sphi %s874_s26, %s948_s26  }
   0x4   : > { %p41_p1 = scmp.ge.s32.totalorder %s39_s5, 2  ;;  %p258_p2 = scmp.lt.s32.totalorder %s824_s28, 3 }
   0x6   : > { %s951_s5 = smov (%p41_p1, %s39_s5), 0  ;;  %p259_p3 = pnand %p724_p0, %p258_p2 }
   0x8   : > { %262 = sbr.rel (%p259_p3) target bundleno = 526 (0x20e), region = 44 }
   0xd   : > { %p302_p4 = scmp.lt.s32.totalorder %s816_s26, 1  ;;  %v350_v2 = vlaneseq  ;;  %v826_v3 = vmov 0.0   ;;  %vm827_vm0 = vmmov 0   ;;  %v451_v4 = vld [vmem:[%s941_s1] sm:$0xff]  ;;  %v828_v6 = vmov 0   ;;  %v547_v7 = vld [vmem:[%s943_s3 + $0x8] sm:$0xff] }
   0xe   : > { %750 = vmatprep.subr.bf16.mxu0 %v826_v3  ;;  %754 = vmatprep.mubr.msk.bf16.mxu0 %vm827_vm0, %v826_v3  ;;  %v450_v28 = vld [vmem:[%s940_s0] sm:$0xf]  ;;  %vm469_vm2 = vcmask 261120   ;;  %vm567_vm3 = vcmask 1043456   ;;  %vm563_vm4 = vcmask 64512  }
   0xf   : > { %s953_s26 = smov (!%p302_p4, %s816_s26), 1  ;;  %v351_v5 = vand.u32 127, %v350_v2  ;;  %791 = vset.pattern.permute.xlu0 %v828_v6  ;;  %758 = vmatprep.subr.bf16.mxu1 %v826_v3  ;;  %v546_v29 = vld [vmem:[%s943_s3] sm:$0xff] }
  0x10   : > { %454 = vperm.xlu0 %791, %v451_v4   ;;  %760 = vmatprep.mubr.msk.bf16.mxu1 %vm827_vm0, %v826_v3  ;;  %s895_s8 = sshll.u32 %s953_s26, 3  ;;  %v795_v4 = vld [vmem:[%s942_s2] sm:$0xff]  }
  0x11   : > { %792 = vset.pattern.permute.xlu1 %v828_v6  ;;  %s669_s13 = scalar_lea.vmem %s944_s4, %s895_s8  ;;  %s318_s16 = scalar_lea.vmem %s946_s6, %s895_s8  ;;  %vm354_vm1 = vcmp.lt.s32.totalorder %v351_v5, 32 }
  0x12   : > { %v732_v8 = vld [vmem:[%s669_s13] sm:$0xff]   ;;  %550 = vperm.xlu1 %792, %v546_v29   ;;  %s325_s25 = scalar_lea.vmem %s947_s7, %s895_s8 }
  0x13   : > { %v346_v9 = vld [vmem:[%s318_s16] sm:$0xff]   ;;  %v407_v10 = vunpack.c.l.bf16 %v732_v8  ;;  %v427_v11 = vunpack.c.h.bf16 %v732_v8 }
  0x14   : > { %v347_v12 = vunpack.c.l.bf16 %v346_v9  ;;  %v387_v13 = vunpack.c.h.bf16 %v346_v9  ;;  %555 = vperm.xlu0 %791, %v547_v7  }
  0x15   : > { %v415_v14 = vsel %vm354_vm1, %v407_v10, %v872_v1  ;;  %v435_v15 = vsel %vm354_vm1, %v427_v11, %v872_v1 }
  0x16   : > { %v355_v16 = vsel %vm354_vm1, %v347_v12, %v872_v1  ;;  %v395_v17 = vsel %vm354_vm1, %v387_v13, %v872_v1  ;;  %v418_v18 = vmax.f32 %v872_v1, %v415_v14  ;;  %v438_v19 = vmax.f32 %v872_v1, %v435_v15 }
  0x17   : > { %v358_v20 = vmax.f32 %v355_v16, %v872_v1  ;;  %v398_v21 = vmax.f32 %v395_v17, %v872_v1 }
  0x18   : > { %v421_v22 = vpack.c.bf16 %v826_v3, %v418_v18  ;;  %v441_v23 = vpack.c.bf16 %v826_v3, %v438_v19 }
  0x19   : > { %v360_v24 = vpack.c.bf16 %v826_v3, %v358_v20  ;;  %v401_v25 = vpack.c.bf16 %v826_v3, %v398_v21 }
  0x1a   : > { %424 = vst [vmem:[#allocation12 + $0x8] sm:$0xf] %v421_v22  ;;  %444 = vst [vmem:[#allocation12 + $0xc] sm:$0xf] %v441_v23 }
  0x1b   : > { %363 = vst [vmem:[#allocation12] sm:$0xf] %v360_v24  ;;  %404 = vst [vmem:[#allocation12 + $0x4] sm:$0xf] %v401_v25 }
  0x21   : > { %v793_v26 = vld [vmem:[#allocation12 + $0x8] sm:$0xff]  }
  0x22   : > { %751 = vmatpush3.bf16.msra.mxu0 %v793_v26  ;;  %v794_v27 = vld [vmem:[#allocation12] sm:$0xff]  }
  0x23   : > { %752 = vmatprep.subr.bf16.mxu0 %v826_v3 }
  0x26   : > { %753 = vmatpush3.bf16.msra.mxu0 %v794_v27 }
  0x29   : > { %755 = vmatmul.mubr.msk.bf16.vlgmr.msra.gmra.mxu0 %vm469_vm2, %v450_v28 }
  0x8b   : > { %v455_v30 = vpop.permute.xlu0 %454 }
  0x8d   : > { %v551_v14 = vpop.permute.xlu1 %550 }
  0x8f   : > { %v556_v7 = vpop.permute.xlu0 %555 }
  0xe9   : > { %v507_v31 = vpop.f32.mrf.mxu0 }
  0xea   : > { %v508_v32 = vadd.f32 %v507_v31, %v455_v30 }
  0xeb   : > { %v756_v33 = vpop.f32.mrf.mxu0 }
  0xec   : > { %v514_v34 = vmul.f32 0.70710677, %v508_v32  ;;  %v513_v62 = vmul.f32 0.5, %v508_v32 }
  0xed   : > { %v510_v35 = vpop.f32.mrf.mxu0 }
  0xee   : > { %v737_v36 = vclamps-f32 %v514_v34, 3.832507 }
  0xef   : > { %v757_v37 = vpop.f32.mrf.mxu0 }
  0xf0   : > { %v517_v38 = vmul.f32 %v737_v36, %v737_v36 }
  0xf2   : > { %v526_v39 = vmul.f32 -1.1791603e-07, %v517_v38  ;;  %v518_v41 = vmul.f32 0.00022905065, %v517_v38 }
  0xf4   : > { %v527_v40 = vadd.f32 2.3547966e-05, %v526_v39  ;;  %v519_v44 = vadd.f32 0.003408291, %v518_v41 }
  0xf6   : > { %v528_v42 = vmul.f32 %v527_v40, %v517_v38  ;;  %v520_v47 = vmul.f32 %v519_v44, %v517_v38 }
  0xf8   : > { %v529_v43 = vadd.f32 0.0010179626, %v528_v42  ;;  %v521_v50 = vadd.f32 0.050955694, %v520_v47 }
  0xfa   : > { %v530_v45 = vmul.f32 %v529_v43, %v517_v38  ;;  %v522_v53 = vmul.f32 %v521_v50, %v517_v38 }
  0xfc   : > { %v531_v46 = vadd.f32 0.01407047, %v530_v45  ;;  %v523_v56 = vadd.f32 0.18520832, %v522_v53 }
  0xfe   : > { %v532_v48 = vmul.f32 %v531_v46, %v517_v38  ;;  %v524_v57 = vmul.f32 %v523_v56, %v517_v38 }
 0x100   : > { %v533_v49 = vadd.f32 0.11098505, %v532_v48  ;;  %v525_v58 = vadd.f32 1.1283791, %v524_v57 }
 0x102   : > { %v534_v51 = vmul.f32 %v533_v49, %v517_v38  ;;  %v538_v59 = vmul.f32 %v737_v36, %v525_v58 }
 0x104   : > { %v535_v52 = vadd.f32 0.49746925, %v534_v51 }
 0x106   : > { %v536_v54 = vmul.f32 %v535_v52, %v517_v38 }
 0x108   : > { %v537_v55 = vadd.f32 1.0, %v536_v54 }
 0x10a   : > { %796 = vrcp.f32 %v537_v55 }
 0x117   : > { %v797_v60 = vpop.eup %796 }
 0x118   : > { %v540_v61 = vmul.f32 %v797_v60, %v538_v59 }
 0x11a   : > { %v541_v63 = vadd.f32 1.0, %v540_v61 }
 0x11c   : > { %v542_v0 = vmul.f32 %v541_v63, %v513_v62 }
 0x11e   : > { %v543_v2 = vpack.c.bf16 %v542_v0, %v542_v0 }
 0x120   : > { %v569_v3 = vsel %vm567_vm3, %v543_v2, 0 }
 0x121   : > { %759 = vmatpush3.bf16.msra.mxu1 %v569_v3 }
 0x124   : > { %761 = vmatmul.mubr.msk.bf16.vlgmr.msra.gmra.mxu1 %vm563_vm4, %v795_v4 }
 0x1e4   : > { %v605_v5 = vpop.f32.mrf.mxu1 }
 0x1e5   : > { %v606_v15 = vadd.f32 %v605_v5, %v551_v14 }
 0x1e6   : > { %v762_v6 = vpop.f32.mrf.mxu1 }
 0x1e8   : > { %v608_v8 = vpop.f32.mrf.mxu1 }
 0x1e9   : > { %v609_v9 = vadd.f32 %v608_v8, %v556_v7 }
 0x1ea   : > { %v763_v10 = vpop.f32.mrf.mxu1 }
 0x1eb   : > { %v740_v11 = vmul.f32 -1.442695, %v609_v9 }
 0x1ed   : > { %798 = vpow2.f32 %v740_v11 }
 0x1fa   : > { %v799_v12 = vpop.eup %798 }
 0x1fb   : > { %v615_v13 = vadd.f32 1.0, %v799_v12 }
 0x1fd   : > { %800 = vrcp.f32 %v615_v13 }
 0x20a   : > { %v801_v16 = vpop.eup %800 }
 0x20b   : > { %v618_v17 = vmul.f32 %v801_v16, %v606_v15 }
 0x20d   : > { %619 = vst.msk [vmem:[%s325_s25] sm:$0xff] %vm469_vm2, %v618_v17 }
 0x20e PF: > { %s27_s28 = sadd.s32 1, %s824_s28   ;;  %s948_s26 = smov %s820_s27 }
 0x20f   : > { %p24_p5 = scmp.ge.s32.totalorder %s27_s28, 4   ;;  %s949_s27 = smov %s951_s5 }
 0x211   :  { %26 = sbr.rel (!%p24_p5) target bundleno = 3 (0x3), region = 84 }

</bundles_post_ra>
